<compile_context>
chip_gen: v7x
topology: tpu7x:2x2x1
jax: 0.10.0
libtpu: 0.0.40
codegen_flags: <defaults>
</compile_context>

<pallas_src>
import functools

import jax
import jax.numpy as jnp
from jax.experimental import pallas as pl
from jax.experimental.pallas import tpu as pltpu


def _gen_kernel(z_ref, w1_ref, b1_ref, w2_ref, b2_ref, w3_ref, b3_ref, o_ref,
                *, compute_dtype):
    def dot(x, w_ref):
        # MXU operands in compute_dtype (f32 or bf16); accumulate in f32.
        return jnp.dot(x.astype(compute_dtype), w_ref[...],
                       preferred_element_type=jnp.float32)

    # Layer 1: Linear(D -> 2D) + ReLU      (bias/ReLU in f32)
    h1 = jnp.maximum(dot(z_ref[...], w1_ref) + b1_ref[...], 0.0)
    # Layer 2: Linear(2D -> 3D) + ReLU
    h2 = jnp.maximum(dot(h1, w2_ref) + b2_ref[...], 0.0)
    # Layer 3: Linear(3D -> D) + Sigmoid
    logits = dot(h2, w3_ref) + b3_ref[...]

    # Numerically-stable sigmoid: exp(-|x|) never overflows (exp -> EUP slot).
    e = jnp.exp(-jnp.abs(logits))
    num = jnp.where(logits >= 0.0, 1.0, e)
    inv = pl.reciprocal(1.0 + e, approx=False)  # approx=True -> EUP, ~1e-4 rel err
    o_ref[...] = (num * inv).astype(o_ref.dtype)


def _pick_batch_tile(B, cap=4096):
    """Largest batch tile <= cap that divides B (multiple of 8 when partial)."""
    if B <= cap:
        return B
    for t in range(cap, 7, -8):  # cap is a multiple of 8, so t always is too
        if B % t == 0:
            return t
    return B  # no clean divisor: run the whole batch as one (large) step


def generator_forward(z, params, *, batch_tile=None, compute_dtype=jnp.float32,
                      single_buffer_weights=True):
    """Fused forward pass of the Generator MLP.

    z: (B, D) float32
    params: dict with w1 (D, 2D), b1 (1, 2D), w2 (2D, 3D), b2 (1, 3D),
            w3 (3D, D), b3 (1, D)   -- all float32.
    batch_tile: rows per grid step; default = min(B, 4096).  With multiple steps the
        batch axis is marked "parallel", so megacore sharding happens automatically
        when each per-core step is compute-meaningful (B in the thousands).
    compute_dtype: dtype fed to the MXU (jnp.bfloat16 recommended on v6e/v7x at
        scaled sizes); accumulation and elementwise math stay f32.
    """
    w1, b1, w2, b2, w3, b3 = (params["w1"], params["b1"], params["w2"],
                              params["b2"], params["w3"], params["b3"])
    B, D = z.shape
    H1 = w1.shape[1]
    H2 = w2.shape[1]
    O = w3.shape[1]

    if batch_tile is None:
        batch_tile = _pick_batch_tile(B)
    assert B % batch_tile == 0, "batch must be divisible by batch_tile"
    if batch_tile < B:
        # (8,128) rule applies only when the block is smaller than the array;
        # z/out blocks are f32, so the sublane minimum is 8.
        assert batch_tile % 8 == 0, "partial batch tiles must be a multiple of 8"

    grid = (B // batch_tile,)

    # Cast weights once in the wrapper (halves weight DMA bytes when bf16).
    w1c = w1.astype(compute_dtype)
    w2c = w2.astype(compute_dtype)
    w3c = w3.astype(compute_dtype)

    # Rough VMEM footprint -> explicit scoped limit (v5e defaults to only 16 MiB).
    w_elems = D * H1 + H1 + H1 * H2 + H2 + H2 * O + O
    est_bytes = (4 * w_elems * 2                    # weights+biases (f32 upper bound, 2 bufs)
                 + 4 * 2 * batch_tile * (D + O)     # double-buffered z / out blocks
                 + 4 * batch_tile * (H1 + H2 + O))  # in-kernel activation temporaries
    vmem_limit_bytes = int(min(max(2 * est_bytes, 32 * 1024 * 1024),
                               48 * 1024 * 1024))   # stay under v7x's 64 MiB physical

    kernel = functools.partial(_gen_kernel, compute_dtype=compute_dtype)

    def build(use_single_buffer):
        # Constant-index (broadcast) weight/bias blocks; single-buffer them so a
        # multi-step grid keeps one resident copy instead of a double buffer.
        w_kwargs = dict(pipeline_mode=pl.Buffered(1)) if use_single_buffer else {}
        in_specs = [
            pl.BlockSpec((batch_tile, D), lambda i: (i, 0)),
            pl.BlockSpec((D, H1), lambda i: (0, 0), **w_kwargs),
            pl.BlockSpec((1, H1), lambda i: (0, 0), **w_kwargs),
            pl.BlockSpec((H1, H2), lambda i: (0, 0), **w_kwargs),
            pl.BlockSpec((1, H2), lambda i: (0, 0), **w_kwargs),
            pl.BlockSpec((H2, O), lambda i: (0, 0), **w_kwargs),
            pl.BlockSpec((1, O), lambda i: (0, 0), **w_kwargs),
        ]
        out_spec = pl.BlockSpec((batch_tile, O), lambda i: (i, 0))
        return pl.pallas_call(
            kernel,
            out_shape=jax.ShapeDtypeStruct((B, O), jnp.float32),
            grid_spec=pltpu.PrefetchScalarGridSpec(
                num_scalar_prefetch=0,
                grid=grid,
                in_specs=in_specs,
                out_specs=out_spec,
            ),
            compiler_params=pltpu.CompilerParams(
                dimension_semantics=("parallel",),
                vmem_limit_bytes=vmem_limit_bytes),
        )

    args = (z, w1c, b1, w2c, b2, w3c, b3)
    if single_buffer_weights:
        try:
            return build(True)(*args)
        except Exception:
            # This jax build doesn't accept pipeline_mode=pl.Buffered(1) on the outer
            # pallas_call pipeline; default double-buffering is harmless at this size.
            pass
    return build(False)(*args)


def init_params(key, input_size):
    """Deterministic init matching PyTorch nn.Linear's default
    U(-1/sqrt(fan_in), 1/sqrt(fan_in)) scheme, for the Generator dims."""
    h1 = 2 * input_size
    h2 = 3 * input_size
    out = input_size
    keys = jax.random.split(key, 6)

    def _lin(kw, kb, fan_in, fan_out):
        bound = 1.0 / jnp.sqrt(fan_in)
        w = jax.random.uniform(kw, (fan_in, fan_out), jnp.float32, -bound, bound)
        b = jax.random.uniform(kb, (1, fan_out), jnp.float32, -bound, bound)
        return w, b

    w1, b1 = _lin(keys[0], keys[1], input_size, h1)
    w2, b2 = _lin(keys[2], keys[3], h1, h2)
    w3, b3 = _lin(keys[4], keys[5], h2, out)
    return dict(w1=w1, b1=b1, w2=w2, b2=b2, w3=w3, b3=b3)


def reference_forward(z, p):
    h1 = jnp.maximum(z @ p["w1"] + p["b1"], 0.0)
    h2 = jnp.maximum(h1 @ p["w2"] + p["b2"], 0.0)
    return jax.nn.sigmoid(h2 @ p["w3"] + p["b3"])


if __name__ == "__main__":
    key = jax.random.PRNGKey(0)
    k_param, k_z = jax.random.split(key)

    batch = 16
    input_size = 32  # -> hidden1 = 64, hidden2 = 96, output = 32

    params = init_params(k_param, input_size)
    z = jax.random.normal(k_z, (batch, input_size), dtype=jnp.float32)

    # Default f32 path (single grid step for B=16): strict check vs reference.
    out = jax.block_until_ready(generator_forward(z, params))
    ref = jax.block_until_ready(reference_forward(z, params))
    assert out.shape == (batch, input_size)
    assert jnp.allclose(out, ref, atol=1e-5, rtol=1e-5), "f32 mismatch vs reference"

    # v6e/v7x path: bf16 MXU operands, f32 accumulation (looser tolerance).
    out_bf16 = jax.block_until_ready(
        generator_forward(z, params, compute_dtype=jnp.bfloat16))
    assert jnp.allclose(out_bf16, ref, atol=2e-2, rtol=2e-2), "bf16 mismatch vs reference"

    print("KERNEL_OK")
</pallas_src>

<mosaic_0001>
module attributes {stable_mosaic.version = 11 : i64} {
  func.func @_gen_kernel(%arg0: i32, %arg1: memref<16x32xf32, #tpu.memory_space<vmem>>, %arg2: memref<32x64xf32, #tpu.memory_space<vmem>>, %arg3: memref<1x64xf32, #tpu.memory_space<vmem>>, %arg4: memref<64x96xf32, #tpu.memory_space<vmem>>, %arg5: memref<1x96xf32, #tpu.memory_space<vmem>>, %arg6: memref<96x32xf32, #tpu.memory_space<vmem>>, %arg7: memref<1x32xf32, #tpu.memory_space<vmem>>, %arg8: memref<16x32xf32, #tpu.memory_space<vmem>>) attributes {dimension_semantics = [#tpu.dimension_semantics<parallel>], iteration_bounds = array<i64: 1>, scalar_prefetch = 0 : i64, scratch_operands = 0 : i64, tpu.core_type = #tpu.core_type<tc>, window_params = [{transform_indices = @transform_0, window_bounds = array<i64: 16, 32>}, {pipeline_mode = #tpu.pipeline_mode<synchronous>, transform_indices = @transform_1, window_bounds = array<i64: 32, 64>}, {pipeline_mode = #tpu.pipeline_mode<synchronous>, transform_indices = @transform_2, window_bounds = array<i64: 1, 64>}, {pipeline_mode = #tpu.pipeline_mode<synchronous>, transform_indices = @transform_3, window_bounds = array<i64: 64, 96>}, {pipeline_mode = #tpu.pipeline_mode<synchronous>, transform_indices = @transform_4, window_bounds = array<i64: 1, 96>}, {pipeline_mode = #tpu.pipeline_mode<synchronous>, transform_indices = @transform_5, window_bounds = array<i64: 96, 32>}, {pipeline_mode = #tpu.pipeline_mode<synchronous>, transform_indices = @transform_6, window_bounds = array<i64: 1, 32>}, {transform_indices = @transform_7, window_bounds = array<i64: 16, 32>}]} {
    %c0 = arith.constant 0 : index
    %c0_0 = arith.constant 0 : index
    %0 = vector.load %arg1[%c0, %c0_0] : memref<16x32xf32, #tpu.memory_space<vmem>>, vector<16x32xf32>
    %c0_1 = arith.constant 0 : index
    %c0_2 = arith.constant 0 : index
    %1 = vector.load %arg2[%c0_1, %c0_2] : memref<32x64xf32, #tpu.memory_space<vmem>>, vector<32x64xf32>
    %cst = arith.constant dense<0.000000e+00> : vector<16x64xf32>
    %2 = tpu.matmul %0, %1, %cst {dimension_numbers = #tpu.dot_dimension_numbers<[1], [0], [0], [1], [0, 0, 1, 1], [], []>} : vector<16x32xf32>, vector<32x64xf32>, vector<16x64xf32> -> vector<16x64xf32>
    %c0_3 = arith.constant 0 : index
    %c0_4 = arith.constant 0 : index
    %3 = vector.load %arg3[%c0_3, %c0_4] : memref<1x64xf32, #tpu.memory_space<vmem>>, vector<1x64xf32>
    %4 = vector.broadcast %3 : vector<1x64xf32> to vector<16x64xf32>
    %5 = arith.addf %2, %4 : vector<16x64xf32>
    %cst_5 = arith.constant 0.000000e+00 : f32
    %6 = vector.broadcast %cst_5 : f32 to vector<16x64xf32>
    %7 = arith.maximumf %5, %6 : vector<16x64xf32>
    %c0_6 = arith.constant 0 : index
    %c0_7 = arith.constant 0 : index
    %8 = vector.load %arg4[%c0_6, %c0_7] : memref<64x96xf32, #tpu.memory_space<vmem>>, vector<64x96xf32>
    %cst_8 = arith.constant dense<0.000000e+00> : vector<16x96xf32>
    %9 = tpu.matmul %7, %8, %cst_8 {dimension_numbers = #tpu.dot_dimension_numbers<[1], [0], [0], [1], [0, 0, 1, 1], [], []>} : vector<16x64xf32>, vector<64x96xf32>, vector<16x96xf32> -> vector<16x96xf32>
    %c0_9 = arith.constant 0 : index
    %c0_10 = arith.constant 0 : index
    %10 = vector.load %arg5[%c0_9, %c0_10] : memref<1x96xf32, #tpu.memory_space<vmem>>, vector<1x96xf32>
    %11 = vector.broadcast %10 : vector<1x96xf32> to vector<16x96xf32>
    %12 = arith.addf %9, %11 : vector<16x96xf32>
    %cst_11 = arith.constant 0.000000e+00 : f32
    %13 = vector.broadcast %cst_11 : f32 to vector<16x96xf32>
    %14 = arith.maximumf %12, %13 : vector<16x96xf32>
    %c0_12 = arith.constant 0 : index
    %c0_13 = arith.constant 0 : index
    %15 = vector.load %arg6[%c0_12, %c0_13] : memref<96x32xf32, #tpu.memory_space<vmem>>, vector<96x32xf32>
    %cst_14 = arith.constant dense<0.000000e+00> : vector<16x32xf32>
    %16 = tpu.matmul %14, %15, %cst_14 {dimension_numbers = #tpu.dot_dimension_numbers<[1], [0], [0], [1], [0, 0, 1, 1], [], []>} : vector<16x96xf32>, vector<96x32xf32>, vector<16x32xf32> -> vector<16x32xf32>
    %c0_15 = arith.constant 0 : index
    %c0_16 = arith.constant 0 : index
    %17 = vector.load %arg7[%c0_15, %c0_16] : memref<1x32xf32, #tpu.memory_space<vmem>>, vector<1x32xf32>
    %18 = vector.broadcast %17 : vector<1x32xf32> to vector<16x32xf32>
    %19 = arith.addf %16, %18 : vector<16x32xf32>
    %20 = math.absf %19 : vector<16x32xf32>
    %cst_17 = arith.constant 0.000000e+00 : f32
    %21 = vector.broadcast %cst_17 : f32 to vector<16x32xf32>
    %22 = arith.subf %21, %20 : vector<16x32xf32>
    %23 = math.exp %22 : vector<16x32xf32>
    %cst_18 = arith.constant 0.000000e+00 : f32
    %24 = vector.broadcast %cst_18 : f32 to vector<16x32xf32>
    %25 = arith.cmpf oge, %19, %24 : vector<16x32xf32>
    %cst_19 = arith.constant 1.000000e+00 : f32
    %26 = vector.broadcast %cst_19 : f32 to vector<16x32xf32>
    %27 = arith.select %25, %26, %23 : vector<16x32xi1>, vector<16x32xf32>
    %cst_20 = arith.constant 1.000000e+00 : f32
    %28 = vector.broadcast %cst_20 : f32 to vector<16x32xf32>
    %29 = arith.addf %28, %23 : vector<16x32xf32>
    %30 = tpu.reciprocal %29 : vector<16x32xf32> -> vector<16x32xf32>
    %31 = arith.mulf %27, %30 : vector<16x32xf32>
    %c0_21 = arith.constant 0 : index
    %c0_22 = arith.constant 0 : index
    %32 = vector.load %arg8[%c0_21, %c0_22] : memref<16x32xf32, #tpu.memory_space<vmem>>, vector<16x32xf32>
    tpu.vector_store %arg8[%c0_21, %c0_22], %31 {strides = array<i32>} : memref<16x32xf32, #tpu.memory_space<vmem>>, vector<16x32xf32>,
    return
  }
  func.func @transform_0(%arg0: i32) -> (i32, i32) {
    %c0_i32 = arith.constant 0 : i32
    %c0_i32_0 = arith.constant 0 : i32
    return %arg0, %c0_i32 : i32, i32
  }
  func.func @transform_1(%arg0: i32) -> (i32, i32) {
    %c0_i32 = arith.constant 0 : i32
    %c0_i32_0 = arith.constant 0 : i32
    %c0_i32_1 = arith.constant 0 : i32
    return %c0_i32, %c0_i32_0 : i32, i32
  }
  func.func @transform_2(%arg0: i32) -> (i32, i32) {
    %c0_i32 = arith.constant 0 : i32
    %c0_i32_0 = arith.constant 0 : i32
    %c0_i32_1 = arith.constant 0 : i32
    return %c0_i32, %c0_i32_0 : i32, i32
  }
  func.func @transform_3(%arg0: i32) -> (i32, i32) {
    %c0_i32 = arith.constant 0 : i32
    %c0_i32_0 = arith.constant 0 : i32
    %c0_i32_1 = arith.constant 0 : i32
    return %c0_i32, %c0_i32_0 : i32, i32
  }
  func.func @transform_4(%arg0: i32) -> (i32, i32) {
    %c0_i32 = arith.constant 0 : i32
    %c0_i32_0 = arith.constant 0 : i32
    %c0_i32_1 = arith.constant 0 : i32
    return %c0_i32, %c0_i32_0 : i32, i32
  }
  func.func @transform_5(%arg0: i32) -> (i32, i32) {
    %c0_i32 = arith.constant 0 : i32
    %c0_i32_0 = arith.constant 0 : i32
    %c0_i32_1 = arith.constant 0 : i32
    return %c0_i32, %c0_i32_0 : i32, i32
  }
  func.func @transform_6(%arg0: i32) -> (i32, i32) {
    %c0_i32 = arith.constant 0 : i32
    %c0_i32_0 = arith.constant 0 : i32
    %c0_i32_1 = arith.constant 0 : i32
    return %c0_i32, %c0_i32_0 : i32, i32
  }
  func.func @transform_7(%arg0: i32) -> (i32, i32) {
    %c0_i32 = arith.constant 0 : i32
    %c0_i32_0 = arith.constant 0 : i32
    return %arg0, %c0_i32 : i32, i32
  }
}

module attributes {stable_mosaic.version = 11 : i64} {
  func.func @_gen_kernel(%arg0: i32, %arg1: memref<16x32xf32, #tpu.memory_space<vmem>>, %arg2: memref<32x64xf32, #tpu.memory_space<vmem>>, %arg3: memref<1x64xf32, #tpu.memory_space<vmem>>, %arg4: memref<64x96xf32, #tpu.memory_space<vmem>>, %arg5: memref<1x96xf32, #tpu.memory_space<vmem>>, %arg6: memref<96x32xf32, #tpu.memory_space<vmem>>, %arg7: memref<1x32xf32, #tpu.memory_space<vmem>>, %arg8: memref<16x32xf32, #tpu.memory_space<vmem>>) attributes {dimension_semantics = [#tpu.dimension_semantics<parallel>], iteration_bounds = array<i64: 1>, scalar_prefetch = 0 : i64, scratch_operands = 0 : i64, tpu.core_type = #tpu.core_type<tc>, window_params = [{transform_indices = @transform_0, window_bounds = array<i64: 16, 32>}, {pipeline_mode = #tpu.pipeline_mode<synchronous>, transform_indices = @transform_1, window_bounds = array<i64: 32, 64>}, {pipeline_mode = #tpu.pipeline_mode<synchronous>, transform_indices = @transform_2, window_bounds = array<i64: 1, 64>}, {pipeline_mode = #tpu.pipeline_mode<synchronous>, transform_indices = @transform_3, window_bounds = array<i64: 64, 96>}, {pipeline_mode = #tpu.pipeline_mode<synchronous>, transform_indices = @transform_4, window_bounds = array<i64: 1, 96>}, {pipeline_mode = #tpu.pipeline_mode<synchronous>, transform_indices = @transform_5, window_bounds = array<i64: 96, 32>}, {pipeline_mode = #tpu.pipeline_mode<synchronous>, transform_indices = @transform_6, window_bounds = array<i64: 1, 32>}, {transform_indices = @transform_7, window_bounds = array<i64: 16, 32>}]} {
    %c0 = arith.constant 0 : index
    %c0_0 = arith.constant 0 : index
    %0 = vector.load %arg1[%c0, %c0_0] : memref<16x32xf32, #tpu.memory_space<vmem>>, vector<16x32xf32>
    %c0_1 = arith.constant 0 : index
    %c0_2 = arith.constant 0 : index
    %1 = vector.load %arg2[%c0_1, %c0_2] : memref<32x64xf32, #tpu.memory_space<vmem>>, vector<32x64xf32>
    %cst = arith.constant dense<0.000000e+00> : vector<16x64xf32>
    %2 = tpu.matmul %0, %1, %cst {dimension_numbers = #tpu.dot_dimension_numbers<[1], [0], [0], [1], [0, 0, 1, 1], [], []>} : vector<16x32xf32>, vector<32x64xf32>, vector<16x64xf32> -> vector<16x64xf32>
    %c0_3 = arith.constant 0 : index
    %c0_4 = arith.constant 0 : index
    %3 = vector.load %arg3[%c0_3, %c0_4] : memref<1x64xf32, #tpu.memory_space<vmem>>, vector<1x64xf32>
    %4 = vector.broadcast %3 : vector<1x64xf32> to vector<16x64xf32>
    %5 = arith.addf %2, %4 : vector<16x64xf32>
    %cst_5 = arith.constant 0.000000e+00 : f32
    %6 = vector.broadcast %cst_5 : f32 to vector<16x64xf32>
    %7 = arith.maximumf %5, %6 : vector<16x64xf32>
    %c0_6 = arith.constant 0 : index
    %c0_7 = arith.constant 0 : index
    %8 = vector.load %arg4[%c0_6, %c0_7] : memref<64x96xf32, #tpu.memory_space<vmem>>, vector<64x96xf32>
    %cst_8 = arith.constant dense<0.000000e+00> : vector<16x96xf32>
    %9 = tpu.matmul %7, %8, %cst_8 {dimension_numbers = #tpu.dot_dimension_numbers<[1], [0], [0], [1], [0, 0, 1, 1], [], []>} : vector<16x64xf32>, vector<64x96xf32>, vector<16x96xf32> -> vector<16x96xf32>
    %c0_9 = arith.constant 0 : index
    %c0_10 = arith.constant 0 : index
    %10 = vector.load %arg5[%c0_9, %c0_10] : memref<1x96xf32, #tpu.memory_space<vmem>>, vector<1x96xf32>
    %11 = vector.broadcast %10 : vector<1x96xf32> to vector<16x96xf32>
    %12 = arith.addf %9, %11 : vector<16x96xf32>
    %cst_11 = arith.constant 0.000000e+00 : f32
    %13 = vector.broadcast %cst_11 : f32 to vector<16x96xf32>
    %14 = arith.maximumf %12, %13 : vector<16x96xf32>
    %c0_12 = arith.constant 0 : index
    %c0_13 = arith.constant 0 : index
    %15 = vector.load %arg6[%c0_12, %c0_13] : memref<96x32xf32, #tpu.memory_space<vmem>>, vector<96x32xf32>
    %cst_14 = arith.constant dense<0.000000e+00> : vector<16x32xf32>
    %16 = tpu.matmul %14, %15, %cst_14 {dimension_numbers = #tpu.dot_dimension_numbers<[1], [0], [0], [1], [0, 0, 1, 1], [], []>} : vector<16x96xf32>, vector<96x32xf32>, vector<16x32xf32> -> vector<16x32xf32>
    %c0_15 = arith.constant 0 : index
    %c0_16 = arith.constant 0 : index
    %17 = vector.load %arg7[%c0_15, %c0_16] : memref<1x32xf32, #tpu.memory_space<vmem>>, vector<1x32xf32>
    %18 = vector.broadcast %17 : vector<1x32xf32> to vector<16x32xf32>
    %19 = arith.addf %16, %18 : vector<16x32xf32>
    %20 = math.absf %19 : vector<16x32xf32>
    %cst_17 = arith.constant 0.000000e+00 : f32
    %21 = vector.broadcast %cst_17 : f32 to vector<16x32xf32>
    %22 = arith.subf %21, %20 : vector<16x32xf32>
    %23 = math.exp %22 : vector<16x32xf32>
    %cst_18 = arith.constant 0.000000e+00 : f32
    %24 = vector.broadcast %cst_18 : f32 to vector<16x32xf32>
    %25 = arith.cmpf oge, %19, %24 : vector<16x32xf32>
    %cst_19 = arith.constant 1.000000e+00 : f32
    %26 = vector.broadcast %cst_19 : f32 to vector<16x32xf32>
    %27 = arith.select %25, %26, %23 : vector<16x32xi1>, vector<16x32xf32>
    %cst_20 = arith.constant 1.000000e+00 : f32
    %28 = vector.broadcast %cst_20 : f32 to vector<16x32xf32>
    %29 = arith.addf %28, %23 : vector<16x32xf32>
    %30 = tpu.reciprocal %29 : vector<16x32xf32> -> vector<16x32xf32>
    %31 = arith.mulf %27, %30 : vector<16x32xf32>
    %c0_21 = arith.constant 0 : index
    %c0_22 = arith.constant 0 : index
    %32 = vector.load %arg8[%c0_21, %c0_22] : memref<16x32xf32, #tpu.memory_space<vmem>>, vector<16x32xf32>
    tpu.vector_store %arg8[%c0_21, %c0_22], %31 {strides = array<i32>} : memref<16x32xf32, #tpu.memory_space<vmem>>, vector<16x32xf32>,
    return
  }
  func.func @transform_0(%arg0: i32) -> (i32, i32) {
    %c0_i32 = arith.constant 0 : i32
    %c0_i32_0 = arith.constant 0 : i32
    return %arg0, %c0_i32 : i32, i32
  }
  func.func @transform_1(%arg0: i32) -> (i32, i32) {
    %c0_i32 = arith.constant 0 : i32
    %c0_i32_0 = arith.constant 0 : i32
    %c0_i32_1 = arith.constant 0 : i32
    return %c0_i32, %c0_i32_0 : i32, i32
  }
  func.func @transform_2(%arg0: i32) -> (i32, i32) {
    %c0_i32 = arith.constant 0 : i32
    %c0_i32_0 = arith.constant 0 : i32
    %c0_i32_1 = arith.constant 0 : i32
    return %c0_i32, %c0_i32_0 : i32, i32
  }
  func.func @transform_3(%arg0: i32) -> (i32, i32) {
    %c0_i32 = arith.constant 0 : i32
    %c0_i32_0 = arith.constant 0 : i32
    %c0_i32_1 = arith.constant 0 : i32
    return %c0_i32, %c0_i32_0 : i32, i32
  }
  func.func @transform_4(%arg0: i32) -> (i32, i32) {
    %c0_i32 = arith.constant 0 : i32
    %c0_i32_0 = arith.constant 0 : i32
    %c0_i32_1 = arith.constant 0 : i32
    return %c0_i32, %c0_i32_0 : i32, i32
  }
  func.func @transform_5(%arg0: i32) -> (i32, i32) {
    %c0_i32 = arith.constant 0 : i32
    %c0_i32_0 = arith.constant 0 : i32
    %c0_i32_1 = arith.constant 0 : i32
    return %c0_i32, %c0_i32_0 : i32, i32
  }
  func.func @transform_6(%arg0: i32) -> (i32, i32) {
    %c0_i32 = arith.constant 0 : i32
    %c0_i32_0 = arith.constant 0 : i32
    %c0_i32_1 = arith.constant 0 : i32
    return %c0_i32, %c0_i32_0 : i32, i32
  }
  func.func @transform_7(%arg0: i32) -> (i32, i32) {
    %c0_i32 = arith.constant 0 : i32
    %c0_i32_0 = arith.constant 0 : i32
    return %arg0, %c0_i32 : i32, i32
  }
}

</mosaic_0001>

<bundles_post_ra>
// kernel: tpu_custom_call.1
= control target key start
LH: loop header
LB: loop body
LE: loop exit
PB: predicated region body
PF: predicated region fallthrough
CT: control target
= control target key end

     0   :  { %vm40_vm0 = vcmask 261120   ;;  %s685_s0 = inlined_call_operand.vmem [shape: f32[16,32], index: 0, kind: input, shape index: {}]   ;;  %s686_s1 = inlined_call_operand.vmem [shape: f32[32,64], index: 1, kind: input, shape index: {}]   ;;  %s687_s2 = inlined_call_operand.vmem [shape: f32[1,64], index: 2, kind: input, shape index: {}]   ;;  %s688_s3 = inlined_call_operand.vmem [shape: f32[64,96], index: 3, kind: input, shape index: {}]   ;;  %s689_s4 = inlined_call_operand.vmem [shape: f32[1,96], index: 4, kind: input, shape index: {}]   ;;  %s690_s5 = inlined_call_operand.vmem [shape: f32[96,32], index: 5, kind: input, shape index: {}]   ;;  %s691_s6 = inlined_call_operand.vmem [shape: f32[1,32], index: 6, kind: input, shape index: {}]   ;;  %s692_s7 = inlined_call_operand.hbm [shape: f32[16,32], index: 7, kind: output, shape index: {}]  }
   0x1   :  { %v29_v0 = vld [vmem:[%s686_s1] sm:$0xff]  ;;  %v30_v1 = vld [vmem:[%s686_s1 + $0x8] sm:$0xff]  ;;  %v31_v2 = vld [vmem:[%s686_s1 + $0x10] sm:$0xff] }
   0x2   :  { %v456_v3 = vpack.c.bf16 %v30_v1, %v29_v0  ;;  %v32_v4 = vld [vmem:[%s686_s1 + $0x18] sm:$0xff]  ;;  %v27_v5 = vld [vmem:[%s685_s0] sm:$0xff]  ;;  %v125_v8 = vld [vmem:[%s688_s3 + $0x8] sm:$0xff] }
   0x3   :  { %v460_v6 = vpack.c.bf16 %v32_v4, %v31_v2  ;;  %407 = vmatprep.mubr.msk.f32.mxu1 %vm40_vm0, %v27_v5  ;;  %v124_v7 = vld [vmem:[%s688_s3] sm:$0xff] }
   0x4   :  { %457 = vmatprep.subr.bf16.mxu1 %v456_v3 }
   0x5   :  { %459 = vmatpush3.bf16.msra.mxu1 %v456_v3 }
   0x6   :  { %12 = vsyncpa [#allocation3], 0  ;;  %461 = vmatprep.subr.bf16.mxu1 %v460_v6  ;;  %v464_v9 = vpack.c.bf16 %v125_v8, %v124_v7  ;;  %v126_v10 = vld [vmem:[%s688_s3 + $0x10] sm:$0xff]  ;;  %v127_v11 = vld [vmem:[%s688_s3 + $0x18] sm:$0xff]  ;;  %vm139_vm1 = vcmask 523264   ;;  %vm242_vm2 = vcmask 785408  }
   0x7   :  { %v28_v12 = vld [vmem:[%s685_s0 + $0x8] sm:$0xff]  ;;  %v468_v13 = vpack.c.bf16 %v127_v11, %v126_v10  ;;  %v128_v14 = vld [vmem:[%s688_s3 + $0x20] sm:$0xff]  ;;  %v130_v17 = vld [vmem:[%s688_s3 + $0x30] sm:$0xff] }
   0x8   :  { %v129_v15 = vld [vmem:[%s688_s3 + $0x28] sm:$0xff]  ;;  %v131_v18 = vld [vmem:[%s688_s3 + $0x38] sm:$0xff]  ;;  %v223_v20 = vld [vmem:[%s690_s5] sm:$0xff] }
   0x9   :  { %463 = vmatpush3.bf16.msra.mxu1 %v460_v6  ;;  %v472_v16 = vpack.c.bf16 %v129_v15, %v128_v14  ;;  %v476_v19 = vpack.c.bf16 %v131_v18, %v130_v17  ;;  %v224_v21 = vld [vmem:[%s690_s5 + $0x8] sm:$0xff]  ;;  %v225_v22 = vld [vmem:[%s690_s5 + $0x10] sm:$0xff]  ;;  %v226_v24 = vld [vmem:[%s690_s5 + $0x18] sm:$0xff] }
   0xa   :  { %465 = vmatprep.subr.bf16.mxu1 %v464_v9  ;;  %v480_v23 = vpack.c.bf16 %v224_v21, %v223_v20  ;;  %v484_v25 = vpack.c.bf16 %v226_v24, %v225_v22  ;;  %v227_v26 = vld [vmem:[%s690_s5 + $0x20] sm:$0xff]  ;;  %v228_v27 = vld [vmem:[%s690_s5 + $0x28] sm:$0xff]  ;;  %v229_v29 = vld [vmem:[%s690_s5 + $0x30] sm:$0xff] }
   0xb   :  { %v488_v28 = vpack.c.bf16 %v228_v27, %v227_v26  ;;  %v230_v30 = vld [vmem:[%s690_s5 + $0x38] sm:$0xff]  ;;  %v231_v32 = vld [vmem:[%s690_s5 + $0x40] sm:$0xff]  ;;  %v232_v33 = vld [vmem:[%s690_s5 + $0x48] sm:$0xff] }
   0xc   :  { %408 = vmatmul.mubr.msk.f32.vlgmr.msra.gmra.mrb[0].mxu1 %vm40_vm0, %v28_v12  ;;  %481 = vmatprep.subr.bf16.mxu0 %v480_v23  ;;  %v492_v31 = vpack.c.bf16 %v230_v30, %v229_v29  ;;  %v496_v34 = vpack.c.bf16 %v232_v33, %v231_v32  ;;  %v360_v35 = vld [vmem:[%s687_s2] ss:$0 sm:$0xff]  ;;  %v233_v42 = vld [vmem:[%s690_s5 + $0x50] sm:$0xff]  ;;  %v234_v43 = vld [vmem:[%s690_s5 + $0x58] sm:$0xff] }
   0xd   :  { %467 = vmatpush3.bf16.msra.mxu1 %v464_v9  ;;  %483 = vmatpush3.bf16.msra.mxu0 %v480_v23  ;;  %v500_v44 = vpack.c.bf16 %v234_v43, %v233_v42  ;;  %v363_v45 = vld [vmem:[%s689_s4] ss:$0 sm:$0xff]  ;;  %s539_s4 = smov [#allocation2]  }
   0xe   :  { %469 = vmatprep.subr.bf16.mxu1 %v468_v13  ;;  %485 = vmatprep.subr.bf16.mxu0 %v484_v25  ;;  %v366_v52 = vld [vmem:[%s691_s6] ss:$0 sm:$0xff]  ;;  %s349_s5 = sshll.u32 %s539_s4, 4  ;;  %s350_s5 = int_to_ptr.vmem [resolvable:$true] %s349_s5 }
   0xf   :  { %s515_s6 = scalar_lea.vmem %s350_s5, 256  ;;  %p520_p1 = scmp.lt.s32.totalorder %s350_s5, %s350_s5 }
  0x10   :  { %p516_p0 = scmp.ne.s32.totalorder %s350_s5, %s515_s6  ;;  %p521_p2 = scmp.lt.s32.totalorder %s515_s6, %s515_s6 }
  0x11   :  { %471 = vmatpush3.bf16.msra.mxu1 %v468_v13  ;;  %487 = vmatpush3.bf16.msra.mxu0 %v484_v25 }
  0x12   :  { %473 = vmatprep.subr.bf16.mxu1 %v472_v16  ;;  %489 = vmatprep.subr.bf16.mxu0 %v488_v28  ;;  %p522_p3 = por %p521_p2, %p520_p1 }
  0x14   :  { %p523_p4 = pnand %p522_p3, %p516_p0 }
  0x15   :  { %475 = vmatpush3.bf16.msra.mxu1 %v472_v16  ;;  %491 = vmatpush3.bf16.msra.mxu0 %v488_v28 }
  0x16   :  { %477 = vmatprep.subr.bf16.mxu1 %v476_v19  ;;  %493 = vmatprep.subr.bf16.mxu0 %v492_v31 }
  0x19   :  { %479 = vmatpush3.bf16.msra.mxu1 %v476_v19  ;;  %495 = vmatpush3.bf16.msra.mxu0 %v492_v31 }
  0x1a   :  { %497 = vmatprep.subr.bf16.mxu0 %v496_v34 }
  0x1d   :  { %499 = vmatpush3.bf16.msra.mxu0 %v496_v34 }
  0x1e   :  { %501 = vmatprep.subr.bf16.mxu0 %v500_v44 }
  0x21   :  { %503 = vmatpush3.bf16.msra.mxu0 %v500_v44 }
  0xdf   :  { %v409_v36 = vpop.f32.mrb[0].mxu1 }
  0xe0   :  { %v119_v37 = vadd.f32 %v409_v36, %v360_v35  ;;  %v113_v38 = vpop.f32.mrb[1].mxu1 }
  0xe1   :  { %v114_v39 = vadd.f32 %v360_v35, %v113_v38 }
  0xe2   :  { %v123_v41 = vmax.f32 %v119_v37, 0.0 }
  0xe3   :  { %v122_v40 = vmax.f32 %v114_v39, 0.0 }
  0xe5   :  { %426 = vmatprep.mubr.msk.f32.mxu1 %vm139_vm1, %v122_v40 }
  0xe6   :  { %427 = vmatmul.mubr.msk.f32.vlgmr.msra.gmra.mrb[2].mxu1 %vm139_vm1, %v123_v41 }
 0x1b9   :  { %v428_v46 = vpop.f32.mrb[2].mxu1 }
 0x1ba   :  { %v218_v47 = vadd.f32 %v428_v46, %v363_v45  ;;  %v212_v48 = vpop.f32.mrb[3].mxu1 }
 0x1bb   :  { %v213_v49 = vadd.f32 %v363_v45, %v212_v48 }
 0x1bc   :  { %v222_v51 = vmax.f32 %v218_v47, 0.0 }
 0x1bd   :  { %v221_v50 = vmax.f32 %v213_v49, 0.0 }
 0x1bf   :  { %453 = vmatprep.mubr.msk.f32.mxu0 %vm242_vm2, %v221_v50 }
 0x1c0   :  { %454 = vmatmul.mubr.msk.f32.vlgmr.msra.gmra.mrb[0].mxu0 %vm242_vm2, %v222_v51 }
 0x293   :  { %v455_v53 = vpop.f32.mrb[0].mxu0 }
 0x294   :  { %v321_v54 = vadd.f32 %v455_v53, %v366_v52  ;;  %v315_v55 = vpop.f32.mrb[1].mxu0 }
 0x295   :  { %v316_v56 = vadd.f32 %v366_v52, %v315_v55 }
 0x296   :  { %v325_v57 = vand.u32 2147483647, %v321_v54  ;;  %vm333_vm3 = vcmp.ge.f32.partialorder %v321_v54, 0.0 }
 0x297   :  { %v324_v58 = vand.u32 2147483647, %v316_v56  ;;  %vm332_vm4 = vcmp.ge.f32.partialorder %v316_v56, 0.0 }
 0x298   :  { %v327_v59 = vsub.f32 0.0, %v325_v57 }
 0x299   :  { %v326_v60 = vsub.f32 0.0, %v324_v58 }
 0x29a   :  { %v330_v61 = vmul.f32 1.442695, %v327_v59 }
 0x29b   :  { %v328_v62 = vmul.f32 1.442695, %v326_v60 }
 0x29c   :  { %507 = vpow2.f32 %v330_v61 }
 0x29d   :  { %509 = vpow2.f32 %v328_v62 }
 0x2a6   :  { %v508_v63 = vpop.eup %507 }
 0x2a7   :  { %v510_v0 = vpop.eup %509  ;;  %v337_v1 = vadd.f32 1.0, %v508_v63  ;;  %v335_v4 = vsel %vm333_vm3, 1.0, %v508_v63 }
 0x2a8   :  { %v336_v2 = vadd.f32 1.0, %v510_v0  ;;  %v334_v7 = vsel %vm332_vm4, 1.0, %v510_v0 }
 0x2a9   :  { %511 = vrcp.f32 %v337_v1 }
 0x2aa   :  { %513 = vrcp.f32 %v336_v2 }
 0x2b3   :  { %v512_v3 = vpop.eup %511 }
 0x2b4   :  { %v514_v5 = vpop.eup %513  ;;  %v341_v6 = vmul.f32 %v512_v3, %v335_v4 }
 0x2b5   :  { %v340_v8 = vmul.f32 %v514_v5, %v334_v7 }
 0x2b6   :  { %343 = vst.msk [vmem:[#allocation2 + $0x8] sm:$0xff] %vm40_vm0, %v341_v6 }
 0x2b7   :  { %342 = vst.msk [vmem:[#allocation2] sm:$0xff] %vm40_vm0, %v340_v8 }
 0x2b8   :  { %526 = shalt.err (!%p523_p4)
}
 0x2b9   :  { %s527_s9 = scalar_lea.hbm %s692_s7, 256 }
 0x2ba   :  { %p528_p5 = scmp.ne.s32.totalorder %s692_s7, %s527_s9  ;;  %p531_p6 = scmp.lt.u32.totalorder %s527_s9, %s692_s7 }
 0x2bc   :  { %p533_p7 = pnand %p531_p6, %p528_p5 }
 0x2be   :  { %536 = shalt.err (!%p533_p7)
}
 0x2bf   :  { %s540_s13 = smov 128   ;;  %s541_s14 = smov 8  }
 0x2c0   :  { %355 = dma.vmem_to_hbm [thread:$0]  %s350_s5, 256, %s692_s7, [#allocation3], %s540_s13, %s540_s13, %s541_s14  }
 0x2c1   :  { %537 = dma.done.wait [#allocation3], 256  }
 0x2c2   :  { %538 = vsyncadd [#allocation3], 4294967040 }
 0x2c3   :  { %359 = vsyncpa [#allocation3], 1 }

// kernel: tpu_custom_call.1
= control target key start
LH: loop header
LB: loop body
LE: loop exit
PB: predicated region body
PF: predicated region fallthrough
CT: control target
= control target key end

     0   :  { %vm40_vm0 = vcmask 261120   ;;  %s685_s0 = inlined_call_operand.vmem [shape: f32[16,32], index: 0, kind: input, shape index: {}]   ;;  %s686_s1 = inlined_call_operand.vmem [shape: f32[32,64], index: 1, kind: input, shape index: {}]   ;;  %s687_s2 = inlined_call_operand.vmem [shape: f32[1,64], index: 2, kind: input, shape index: {}]   ;;  %s688_s3 = inlined_call_operand.vmem [shape: f32[64,96], index: 3, kind: input, shape index: {}]   ;;  %s689_s4 = inlined_call_operand.vmem [shape: f32[1,96], index: 4, kind: input, shape index: {}]   ;;  %s690_s5 = inlined_call_operand.vmem [shape: f32[96,32], index: 5, kind: input, shape index: {}]   ;;  %s691_s6 = inlined_call_operand.vmem [shape: f32[1,32], index: 6, kind: input, shape index: {}]   ;;  %s692_s7 = inlined_call_operand.hbm [shape: f32[16,32], index: 7, kind: output, shape index: {}]  }
   0x1   :  { %v29_v0 = vld [vmem:[%s686_s1] sm:$0xff]  ;;  %v30_v1 = vld [vmem:[%s686_s1 + $0x8] sm:$0xff]  ;;  %v31_v2 = vld [vmem:[%s686_s1 + $0x10] sm:$0xff] }
   0x2   :  { %v456_v3 = vpack.c.bf16 %v30_v1, %v29_v0  ;;  %v32_v4 = vld [vmem:[%s686_s1 + $0x18] sm:$0xff]  ;;  %v27_v5 = vld [vmem:[%s685_s0] sm:$0xff]  ;;  %v125_v8 = vld [vmem:[%s688_s3 + $0x8] sm:$0xff] }
   0x3   :  { %v460_v6 = vpack.c.bf16 %v32_v4, %v31_v2  ;;  %407 = vmatprep.mubr.msk.f32.mxu1 %vm40_vm0, %v27_v5  ;;  %v124_v7 = vld [vmem:[%s688_s3] sm:$0xff] }
   0x4   :  { %457 = vmatprep.subr.bf16.mxu1 %v456_v3 }
   0x5   :  { %459 = vmatpush3.bf16.msra.mxu1 %v456_v3 }
   0x6   :  { %12 = vsyncpa [#allocation3], 0  ;;  %461 = vmatprep.subr.bf16.mxu1 %v460_v6  ;;  %v464_v9 = vpack.c.bf16 %v125_v8, %v124_v7  ;;  %v126_v10 = vld [vmem:[%s688_s3 + $0x10] sm:$0xff]  ;;  %v127_v11 = vld [vmem:[%s688_s3 + $0x18] sm:$0xff]  ;;  %vm139_vm1 = vcmask 523264   ;;  %vm242_vm2 = vcmask 785408  }
   0x7   :  { %v28_v12 = vld [vmem:[%s685_s0 + $0x8] sm:$0xff]  ;;  %v468_v13 = vpack.c.bf16 %v127_v11, %v126_v10  ;;  %v128_v14 = vld [vmem:[%s688_s3 + $0x20] sm:$0xff]  ;;  %v130_v17 = vld [vmem:[%s688_s3 + $0x30] sm:$0xff] }
   0x8   :  { %v129_v15 = vld [vmem:[%s688_s3 + $0x28] sm:$0xff]  ;;  %v131_v18 = vld [vmem:[%s688_s3 + $0x38] sm:$0xff]  ;;  %v223_v20 = vld [vmem:[%s690_s5] sm:$0xff] }
   0x9   :  { %463 = vmatpush3.bf16.msra.mxu1 %v460_v6  ;;  %v472_v16 = vpack.c.bf16 %v129_v15, %v128_v14  ;;  %v476_v19 = vpack.c.bf16 %v131_v18, %v130_v17  ;;  %v224_v21 = vld [vmem:[%s690_s5 + $0x8] sm:$0xff]  ;;  %v225_v22 = vld [vmem:[%s690_s5 + $0x10] sm:$0xff]  ;;  %v226_v24 = vld [vmem:[%s690_s5 + $0x18] sm:$0xff] }
   0xa   :  { %465 = vmatprep.subr.bf16.mxu1 %v464_v9  ;;  %v480_v23 = vpack.c.bf16 %v224_v21, %v223_v20  ;;  %v484_v25 = vpack.c.bf16 %v226_v24, %v225_v22  ;;  %v227_v26 = vld [vmem:[%s690_s5 + $0x20] sm:$0xff]  ;;  %v228_v27 = vld [vmem:[%s690_s5 + $0x28] sm:$0xff]  ;;  %v229_v29 = vld [vmem:[%s690_s5 + $0x30] sm:$0xff] }
   0xb   :  { %v488_v28 = vpack.c.bf16 %v228_v27, %v227_v26  ;;  %v230_v30 = vld [vmem:[%s690_s5 + $0x38] sm:$0xff]  ;;  %v231_v32 = vld [vmem:[%s690_s5 + $0x40] sm:$0xff]  ;;  %v232_v33 = vld [vmem:[%s690_s5 + $0x48] sm:$0xff] }
   0xc   :  { %408 = vmatmul.mubr.msk.f32.vlgmr.msra.gmra.mrb[0].mxu1 %vm40_vm0, %v28_v12  ;;  %481 = vmatprep.subr.bf16.mxu0 %v480_v23  ;;  %v492_v31 = vpack.c.bf16 %v230_v30, %v229_v29  ;;  %v496_v34 = vpack.c.bf16 %v232_v33, %v231_v32  ;;  %v360_v35 = vld [vmem:[%s687_s2] ss:$0 sm:$0xff]  ;;  %v233_v42 = vld [vmem:[%s690_s5 + $0x50] sm:$0xff]  ;;  %v234_v43 = vld [vmem:[%s690_s5 + $0x58] sm:$0xff] }
   0xd   :  { %467 = vmatpush3.bf16.msra.mxu1 %v464_v9  ;;  %483 = vmatpush3.bf16.msra.mxu0 %v480_v23  ;;  %v500_v44 = vpack.c.bf16 %v234_v43, %v233_v42  ;;  %v363_v45 = vld [vmem:[%s689_s4] ss:$0 sm:$0xff]  ;;  %s539_s4 = smov [#allocation2]  }
   0xe   :  { %469 = vmatprep.subr.bf16.mxu1 %v468_v13  ;;  %485 = vmatprep.subr.bf16.mxu0 %v484_v25  ;;  %v366_v52 = vld [vmem:[%s691_s6] ss:$0 sm:$0xff]  ;;  %s349_s5 = sshll.u32 %s539_s4, 4  ;;  %s350_s5 = int_to_ptr.vmem [resolvable:$true] %s349_s5 }
   0xf   :  { %s515_s6 = scalar_lea.vmem %s350_s5, 256  ;;  %p520_p1 = scmp.lt.s32.totalorder %s350_s5, %s350_s5 }
  0x10   :  { %p516_p0 = scmp.ne.s32.totalorder %s350_s5, %s515_s6  ;;  %p521_p2 = scmp.lt.s32.totalorder %s515_s6, %s515_s6 }
  0x11   :  { %471 = vmatpush3.bf16.msra.mxu1 %v468_v13  ;;  %487 = vmatpush3.bf16.msra.mxu0 %v484_v25 }
  0x12   :  { %473 = vmatprep.subr.bf16.mxu1 %v472_v16  ;;  %489 = vmatprep.subr.bf16.mxu0 %v488_v28  ;;  %p522_p3 = por %p521_p2, %p520_p1 }
  0x14   :  { %p523_p4 = pnand %p522_p3, %p516_p0 }
  0x15   :  { %475 = vmatpush3.bf16.msra.mxu1 %v472_v16  ;;  %491 = vmatpush3.bf16.msra.mxu0 %v488_v28 }
  0x16   :  { %477 = vmatprep.subr.bf16.mxu1 %v476_v19  ;;  %493 = vmatprep.subr.bf16.mxu0 %v492_v31 }
  0x19   :  { %479 = vmatpush3.bf16.msra.mxu1 %v476_v19  ;;  %495 = vmatpush3.bf16.msra.mxu0 %v492_v31 }
  0x1a   :  { %497 = vmatprep.subr.bf16.mxu0 %v496_v34 }
  0x1d   :  { %499 = vmatpush3.bf16.msra.mxu0 %v496_v34 }
  0x1e   :  { %501 = vmatprep.subr.bf16.mxu0 %v500_v44 }
  0x21   :  { %503 = vmatpush3.bf16.msra.mxu0 %v500_v44 }
  0xdf   :  { %v409_v36 = vpop.f32.mrb[0].mxu1 }
  0xe0   :  { %v119_v37 = vadd.f32 %v409_v36, %v360_v35  ;;  %v113_v38 = vpop.f32.mrb[1].mxu1 }
  0xe1   :  { %v114_v39 = vadd.f32 %v360_v35, %v113_v38 }
  0xe2   :  { %v123_v41 = vmax.f32 %v119_v37, 0.0 }
  0xe3   :  { %v122_v40 = vmax.f32 %v114_v39, 0.0 }
  0xe5   :  { %426 = vmatprep.mubr.msk.f32.mxu1 %vm139_vm1, %v122_v40 }
  0xe6   :  { %427 = vmatmul.mubr.msk.f32.vlgmr.msra.gmra.mrb[2].mxu1 %vm139_vm1, %v123_v41 }
 0x1b9   :  { %v428_v46 = vpop.f32.mrb[2].mxu1 }
 0x1ba   :  { %v218_v47 = vadd.f32 %v428_v46, %v363_v45  ;;  %v212_v48 = vpop.f32.mrb[3].mxu1 }
 0x1bb   :  { %v213_v49 = vadd.f32 %v363_v45, %v212_v48 }
 0x1bc   :  { %v222_v51 = vmax.f32 %v218_v47, 0.0 }
 0x1bd   :  { %v221_v50 = vmax.f32 %v213_v49, 0.0 }
 0x1bf   :  { %453 = vmatprep.mubr.msk.f32.mxu0 %vm242_vm2, %v221_v50 }
 0x1c0   :  { %454 = vmatmul.mubr.msk.f32.vlgmr.msra.gmra.mrb[0].mxu0 %vm242_vm2, %v222_v51 }
 0x293   :  { %v455_v53 = vpop.f32.mrb[0].mxu0 }
 0x294   :  { %v321_v54 = vadd.f32 %v455_v53, %v366_v52  ;;  %v315_v55 = vpop.f32.mrb[1].mxu0 }
 0x295   :  { %v316_v56 = vadd.f32 %v366_v52, %v315_v55 }
 0x296   :  { %v325_v57 = vand.u32 2147483647, %v321_v54  ;;  %vm333_vm3 = vcmp.ge.f32.partialorder %v321_v54, 0.0 }
 0x297   :  { %v324_v58 = vand.u32 2147483647, %v316_v56  ;;  %vm332_vm4 = vcmp.ge.f32.partialorder %v316_v56, 0.0 }
 0x298   :  { %v327_v59 = vsub.f32 0.0, %v325_v57 }
 0x299   :  { %v326_v60 = vsub.f32 0.0, %v324_v58 }
 0x29a   :  { %v330_v61 = vmul.f32 1.442695, %v327_v59 }
 0x29b   :  { %v328_v62 = vmul.f32 1.442695, %v326_v60 }
 0x29c   :  { %507 = vpow2.f32 %v330_v61 }
 0x29d   :  { %509 = vpow2.f32 %v328_v62 }
 0x2a6   :  { %v508_v63 = vpop.eup %507 }
 0x2a7   :  { %v510_v0 = vpop.eup %509  ;;  %v337_v1 = vadd.f32 1.0, %v508_v63  ;;  %v335_v4 = vsel %vm333_vm3, 1.0, %v508_v63 }
 0x2a8   :  { %v336_v2 = vadd.f32 1.0, %v510_v0  ;;  %v334_v7 = vsel %vm332_vm4, 1.0, %v510_v0 }
 0x2a9   :  { %511 = vrcp.f32 %v337_v1 }
 0x2aa   :  { %513 = vrcp.f32 %v336_v2 }
 0x2b3   :  { %v512_v3 = vpop.eup %511 }
 0x2b4   :  { %v514_v5 = vpop.eup %513  ;;  %v341_v6 = vmul.f32 %v512_v3, %v335_v4 }
 0x2b5   :  { %v340_v8 = vmul.f32 %v514_v5, %v334_v7 }
 0x2b6   :  { %343 = vst.msk [vmem:[#allocation2 + $0x8] sm:$0xff] %vm40_vm0, %v341_v6 }
 0x2b7   :  { %342 = vst.msk [vmem:[#allocation2] sm:$0xff] %vm40_vm0, %v340_v8 }
 0x2b8   :  { %526 = shalt.err (!%p523_p4)
}
 0x2b9   :  { %s527_s9 = scalar_lea.hbm %s692_s7, 256 }
 0x2ba   :  { %p528_p5 = scmp.ne.s32.totalorder %s692_s7, %s527_s9  ;;  %p531_p6 = scmp.lt.u32.totalorder %s527_s9, %s692_s7 }
 0x2bc   :  { %p533_p7 = pnand %p531_p6, %p528_p5 }
 0x2be   :  { %536 = shalt.err (!%p533_p7)
}
 0x2bf   :  { %s540_s13 = smov 128   ;;  %s541_s14 = smov 8  }
 0x2c0   :  { %355 = dma.vmem_to_hbm [thread:$0]  %s350_s5, 256, %s692_s7, [#allocation3], %s540_s13, %s540_s13, %s541_s14  }
 0x2c1   :  { %537 = dma.done.wait [#allocation3], 256  }
 0x2c2   :  { %538 = vsyncadd [#allocation3], 4294967040 }
 0x2c3   :  { %359 = vsyncpa [#allocation3], 1 }

</bundles_post_ra>
